<compile_context>
chip_gen: v6e
topology: v6e:2x2x1
jax: 0.10.0
libtpu: 0.0.40
codegen_flags: <defaults>
</compile_context>

<pallas_src>
import functools

import jax
import jax.numpy as jnp
from jax.experimental import pallas as pl
from jax.experimental.pallas import tpu as pltpu


# ---------------------------------------------------------------------------
# Pass 1: per-batch prefix sums.
#   csum[b, j, :]       = sum_{k<=j} x[b, k, :]
#   csum_shift[b, i, :] = sum_{k< i} x[b, k, :] = csum[b, i, :] - x[b, i, :]
# ---------------------------------------------------------------------------
def _cumsum_kernel(x_ref, csum_ref, cshift_ref):
    x = x_ref[0]                                            # (L, H), input dtype
    L = x.shape[0]
    row = jax.lax.broadcasted_iota(jnp.int32, (L, L), 0)
    col = jax.lax.broadcasted_iota(jnp.int32, (L, L), 1)
    # Keep the mask in the input dtype so bf16 inputs run a bf16 MXU matmul.
    tri_incl = (col <= row).astype(x.dtype)                 # M[j, k] = 1 iff k <= j
    csum = jnp.dot(tri_incl, x, preferred_element_type=jnp.float32)  # (L, H) f32
    csum_ref[0] = csum
    # tri_strict @ x == tri_incl @ x - x  (exact in f32): no second matmul.
    cshift_ref[0] = csum - x.astype(jnp.float32)


# ---------------------------------------------------------------------------
# Pass 2: streaming (i, j)-tiled phrase means.
# ---------------------------------------------------------------------------
def _phrase_tile_kernel(csum_j_ref, cshift_i_ref, o_ref, *, ti, tj):
    # csum_j_ref  : (1, TJ, H) f32   inclusive prefix sums, j-row block
    # cshift_i_ref: (1, TI, H) f32   exclusive prefix sums, i-row block
    # o_ref       : (1, TI, TJ, H)   output tile (input dtype)
    c_j = csum_j_ref[0]                                     # (TJ, H)
    c_i = cshift_i_ref[0]                                   # (TI, H)

    i0 = pl.program_id(1) * ti
    j0 = pl.program_id(2) * tj
    ii = i0 + jax.lax.broadcasted_iota(jnp.int32, (ti, tj), 0)
    jj = j0 + jax.lax.broadcasted_iota(jnp.int32, (ti, tj), 1)
    # Exact reciprocal of the integer span length: only TI*TJ divides per tile
    # (not TI*TJ*H); the per-element work is then a single VPU multiply.
    inv_denom = 1.0 / (jnp.abs(jj - ii) + 1).astype(jnp.float32)      # (TI, TJ)

    # Fused broadcast-subtract * reciprocal -> cast -> store.
    o_ref[0] = ((c_j[None, :, :] - c_i[:, None, :])
                * inv_denom[:, :, None]).astype(o_ref.dtype)


# ---------------------------------------------------------------------------
# Wrapper
# ---------------------------------------------------------------------------
_VMEM_TILE_BUDGET = 28 * 1024 * 1024    # conservative across v5e / v6e / v7x


def _pick_tile(L, H, out_itemsize, budget_bytes=_VMEM_TILE_BUDGET):
    """Largest divisor of L (preferring multiples of 8) whose double-buffered
    output tile + input row blocks fit the VMEM budget."""
    divisors = [d for d in range(L, 0, -1) if L % d == 0]

    def fits(t):
        out_tiles = 2 * t * t * H * out_itemsize            # dbl-buffered out block
        in_tiles = 2 * 2 * t * H * 4                        # csum_j + cshift_i (f32)
        return out_tiles + in_tiles <= budget_bytes

    for want_mult8 in (True, False):
        for d in divisors:
            if want_mult8 and d % 8 != 0:
                continue
            if fits(d):
                return d
    return 1


def phrase_encode_mean(seq_hiddens: jax.Array) -> jax.Array:
    """seq_hiddens [B, L, H] -> phrase_hiddens [B, L, L, H] (mean pooling)."""
    B, L, H = seq_hiddens.shape
    out_dtype = seq_hiddens.dtype
    out_itemsize = jnp.dtype(out_dtype).itemsize

    # ---- pass 1: prefix sums, once per batch element (tiny) ----
    csum, cshift = pl.pallas_call(
        _cumsum_kernel,
        out_shape=(jax.ShapeDtypeStruct((B, L, H), jnp.float32),
                   jax.ShapeDtypeStruct((B, L, H), jnp.float32)),
        grid_spec=pltpu.PrefetchScalarGridSpec(
            num_scalar_prefetch=0,
            grid=(B,),
            in_specs=[pl.BlockSpec((1, L, H), lambda b: (b, 0, 0))],
            out_specs=(pl.BlockSpec((1, L, H), lambda b: (b, 0, 0)),
                       pl.BlockSpec((1, L, H), lambda b: (b, 0, 0))),
        ),
        compiler_params=pltpu.CompilerParams(
            dimension_semantics=("parallel",)),
    )(seq_hiddens)

    # ---- pass 2: streaming tiled output ----
    t = _pick_tile(L, H, out_itemsize)
    ti = tj = t
    ni, nj = L // ti, L // tj

    tile_out_bytes = ti * tj * H * out_itemsize
    vmem_limit = int(min(48 << 20,
                         max(32 << 20,
                             3 * tile_out_bytes + 16 * t * H * 4 + (4 << 20))))

    out_bytes = B * L * L * H * out_itemsize
    in_bytes = B * ni * L * H * 4 + B * L * H * 4           # csum re-reads + cshift
    cost = pl.CostEstimate(flops=3 * B * L * L * H,
                           transcendentals=0,
                           bytes_accessed=out_bytes + in_bytes)

    kernel = functools.partial(_phrase_tile_kernel, ti=ti, tj=tj)
    phrase_hiddens = pl.pallas_call(
        kernel,
        out_shape=jax.ShapeDtypeStruct((B, L, L, H), out_dtype),
        grid_spec=pltpu.PrefetchScalarGridSpec(
            num_scalar_prefetch=0,
            grid=(B, ni, nj),
            in_specs=[
                pl.BlockSpec((1, tj, H), lambda b, i, j: (b, j, 0)),   # csum (j rows)
                pl.BlockSpec((1, ti, H), lambda b, i, j: (b, i, 0)),   # cshift (i rows)
            ],
            out_specs=pl.BlockSpec((1, ti, tj, H),
                                   lambda b, i, j: (b, i, j, 0)),
        ),
        compiler_params=pltpu.CompilerParams(
            dimension_semantics=("parallel", "parallel", "parallel"),
            vmem_limit_bytes=vmem_limit),
        cost_estimate=cost,
    )(csum, cshift)
    return phrase_hiddens


# ---------------------------------------------------------------------------
# Pure-JAX reference mirroring the PyTorch mean() path.
# ---------------------------------------------------------------------------
def phrase_encode_mean_ref(seq_hiddens: jax.Array) -> jax.Array:
    B, L, H = seq_hiddens.shape
    csum = jnp.cumsum(seq_hiddens.astype(jnp.float32), axis=1)          # (B, L, H)
    pad = jnp.zeros((B, 1, H), jnp.float32)
    csum_shift = jnp.concatenate([pad, csum[:, :-1, :]], axis=1)        # (B, L, H)
    diff = csum[:, None, :, :] - csum_shift[:, :, None, :]              # (B, L, L, H)
    r = jnp.arange(L)
    denom = (jnp.abs(r[None, :] - r[:, None]) + 1).astype(jnp.float32)
    return (diff / denom[None, :, :, None]).astype(seq_hiddens.dtype)


if __name__ == "__main__":
    # Small shapes consistent with the module: batch=2, seq=8, hidden=32.
    B, L, H = 2, 8, 32
    key = jax.random.PRNGKey(0)
    # Deterministic stand-in for outputs['seq_hiddens'] from the base encoder.
    seq_hiddens = jax.random.normal(key, (B, L, H), dtype=jnp.float32)

    phrase_hiddens = phrase_encode_mean(seq_hiddens)
    phrase_hiddens = jax.block_until_ready(phrase_hiddens)

    ref = phrase_encode_mean_ref(seq_hiddens)
    assert phrase_hiddens.shape == (B, L, L, H)
    assert jnp.allclose(phrase_hiddens, ref, rtol=1e-5, atol=1e-4), (
        float(jnp.max(jnp.abs(phrase_hiddens - ref))))

    print("KERNEL_OK")
</pallas_src>

<mosaic_0001>
module attributes {stable_mosaic.version = 11 : i64} {
  func.func @_cumsum_kernel(%arg0: i32, %arg1: memref<1x8x32xf32, #tpu.memory_space<vmem>>, %arg2: memref<1x8x32xf32, #tpu.memory_space<vmem>>, %arg3: memref<1x8x32xf32, #tpu.memory_space<vmem>>) attributes {dimension_semantics = [#tpu.dimension_semantics<parallel>], iteration_bounds = array<i64: 2>, scalar_prefetch = 0 : i64, scratch_operands = 0 : i64, tpu.core_type = #tpu.core_type<tc>, window_params = [{transform_indices = @transform_0, window_bounds = array<i64: 1, 8, 32>}, {transform_indices = @transform_1, window_bounds = array<i64: 1, 8, 32>}, {transform_indices = @transform_2, window_bounds = array<i64: 1, 8, 32>}]} {
    %c0 = arith.constant 0 : index
    %c0_0 = arith.constant 0 : index
    %c0_1 = arith.constant 0 : index
    %0 = vector.load %arg1[%c0, %c0_0, %c0_1] : memref<1x8x32xf32, #tpu.memory_space<vmem>>, vector<1x8x32xf32>
    %1 = vector.shape_cast %0 : vector<1x8x32xf32> to vector<8x32xf32>
    %2 = tpu.iota {dimensions = array<i32: 0>} : vector<8x8xi32>
    %3 = tpu.iota {dimensions = array<i32: 1>} : vector<8x8xi32>
    %4 = arith.cmpi sle, %3, %2 : vector<8x8xi32>
    %5 = arith.extui %4 : vector<8x8xi1> to vector<8x8xi32>
    %6 = arith.sitofp %5 : vector<8x8xi32> to vector<8x8xf32>
    %cst = arith.constant dense<0.000000e+00> : vector<8x32xf32>
    %7 = tpu.matmul %6, %1, %cst {dimension_numbers = #tpu.dot_dimension_numbers<[1], [0], [0], [1], [0, 0, 1, 1], [], []>} : vector<8x8xf32>, vector<8x32xf32>, vector<8x32xf32> -> vector<8x32xf32>
    %c0_2 = arith.constant 0 : index
    %c0_3 = arith.constant 0 : index
    %c0_4 = arith.constant 0 : index
    %8 = vector.load %arg2[%c0_2, %c0_3, %c0_4] : memref<1x8x32xf32, #tpu.memory_space<vmem>>, vector<1x8x32xf32>
    %9 = vector.shape_cast %8 : vector<1x8x32xf32> to vector<8x32xf32>
    %10 = vector.shape_cast %7 : vector<8x32xf32> to vector<1x8x32xf32>
    tpu.vector_store %arg2[%c0_2, %c0_3, %c0_4], %10 {strides = array<i32>} : memref<1x8x32xf32, #tpu.memory_space<vmem>>, vector<1x8x32xf32>,
    %11 = arith.subf %7, %1 : vector<8x32xf32>
    %c0_5 = arith.constant 0 : index
    %c0_6 = arith.constant 0 : index
    %c0_7 = arith.constant 0 : index
    %12 = vector.load %arg3[%c0_5, %c0_6, %c0_7] : memref<1x8x32xf32, #tpu.memory_space<vmem>>, vector<1x8x32xf32>
    %13 = vector.shape_cast %12 : vector<1x8x32xf32> to vector<8x32xf32>
    %14 = vector.shape_cast %11 : vector<8x32xf32> to vector<1x8x32xf32>
    tpu.vector_store %arg3[%c0_5, %c0_6, %c0_7], %14 {strides = array<i32>} : memref<1x8x32xf32, #tpu.memory_space<vmem>>, vector<1x8x32xf32>,
    return
  }
  func.func @transform_0(%arg0: i32) -> (i32, i32, i32) {
    %c0_i32 = arith.constant 0 : i32
    %c0_i32_0 = arith.constant 0 : i32
    %c0_i32_1 = arith.constant 0 : i32
    return %arg0, %c0_i32, %c0_i32_0 : i32, i32, i32
  }
  func.func @transform_1(%arg0: i32) -> (i32, i32, i32) {
    %c0_i32 = arith.constant 0 : i32
    %c0_i32_0 = arith.constant 0 : i32
    %c0_i32_1 = arith.constant 0 : i32
    return %arg0, %c0_i32, %c0_i32_0 : i32, i32, i32
  }
  func.func @transform_2(%arg0: i32) -> (i32, i32, i32) {
    %c0_i32 = arith.constant 0 : i32
    %c0_i32_0 = arith.constant 0 : i32
    %c0_i32_1 = arith.constant 0 : i32
    return %arg0, %c0_i32, %c0_i32_0 : i32, i32, i32
  }
}

</mosaic_0001>

<bundles_post_ra>
// kernel: tpu_custom_call.1
= control target key start
LH: loop header
LB: loop body
LE: loop exit
PB: predicated region body
PF: predicated region fallthrough
CT: control target
= control target key end

     0   :  { %8 = vsyncpa [#allocation3], 0  ;;  %s803_s0 = inlined_call_operand.hbm [shape: f32[2,8,32], index: 0, kind: input, shape index: {}]   ;;  %s804_s1 = inlined_call_operand.hbm [shape: f32[2,8,32], index: 1, kind: output, shape index: {0}]   ;;  %s805_s2 = inlined_call_operand.hbm [shape: f32[2,8,32], index: 2, kind: output, shape index: {1}]  }
   0x1   :  { %10 = vsyncpa [#allocation3 + $0x1], 0 }
   0x2   :  { %11 = vsyncpa [#allocation4], 0 }
   0x3   :  { %13 = vsyncpa [#allocation4 + $0x1], 0 }
   0x4   :  { %14 = vsyncpa [#allocation7], 0 }
   0x5   :  { %16 = vsyncpa [#allocation7 + $0x1], 0  ;;  %s611_s9 = smov 0   ;;  %s613_s10 = smov 0  }
   0x6   :  { %s615_s11 = smov 0   ;;  %s617_s12 = smov 0  }
   0x7 LB: > { %s632_s13 = sadd.s32 4294967295, %s589_s12   ;;  %s390_s14 = sadd.s32 4294967294, %s589_s12   ;;  %s589_s12 = sphi %s617_s12, %s822_s12   ;;  %s585_s11 = sphi %s615_s11, %s821_s11   ;;  %s581_s10 = sphi %s613_s10, %s820_s10   ;;  %s577_s9 = sphi %s611_s9, %s819_s9  }
   0x8   : > { %s636_s15 = sadd.s32 1, %s589_s12   ;;  %s29_s16 = sadd.s32 1, %s585_s11 }
   0x9   : > { %s26_s17 = ssub.s32 %s589_s12, %s636_s15  ;;  %p36_p0 = scmp.ne.s32.totalorder %s585_s11, %s581_s10 }
   0xa   : > { %p27_p1 = scmp.eq.s32.totalorder %s26_s17, 0  ;;  %p37_p2 = scmp.eq.s32.totalorder %s589_s12, 0 }
   0xb   : > { %p42_p3 = scmp.ne.s32.totalorder %s581_s10, %s577_s9  ;;  %p43_p4 = scmp.eq.s32.totalorder %s632_s13, 0 }
   0xc   : > { %s648_s18 = scalar_select %p27_p1, %s585_s11, %s29_s16  }
   0xd   : > { %p650_p5 = por %p37_p2, %p36_p0  ;;  %p654_p6 = por %p43_p4, %p42_p3 }
   0xe   : > { %p66_p7 = scmp.eq.s32.totalorder %s632_s13, 1  ;;  %p72_p8 = scmp.eq.s32.totalorder %s390_s14, 1 }
   0xf   : > { %s809_s20 = scalar_select %p654_p6, 1, 0 }
  0x10   : > { %p431_p10 = scmp.lt.s32.totalorder %s589_s12, 2  ;;  %p661_p11 = por %p66_p7, %p36_p0 }
  0x11   : > { %p665_p12 = por %p72_p8, %p42_p3  ;;  %s118_s23 = sand.u32 1, %s585_s11  }
  0x12   : > { %s810_s21 = scalar_select %p661_p11, 1, 0 }
  0x13   : > { %s811_s22 = scalar_select %p665_p12, 1, 0 }
  0x14   : > { %s394_s24 = sshll.u32 %s589_s12, 7  ;;  %s393_s25 = sshll.u32 %s118_s23, 3 }
  0x15   : > { %s674_s28 = scalar_lea.hbm %s803_s0, %s394_s24  ;;  %s122_s29 = scalar_lea.vmem [#allocation2], %s393_s25 }
  0x16   : > { %s129_s30 = sshll.u32 %s122_s29, 4  ;;  %p678_p13 = pnand %p431_p10, %p650_p5  ;;  %s682_s30 = int_to_ptr.vmem [resolvable:$true] %s129_s30 }
  0x17   : > { %s119_s4 = scalar_lea.sflag [#allocation3], %s118_s23  ;;  %s467_s5 = scalar_lea.hbm %s674_s28, 128 }
  0x18   : > { %p468_p2 = scmp.ne.s32.totalorder %s674_s28, %s467_s5  ;;  %p469_p3 = pneg %p678_p13 }
  0x19   : > { %s472_s8 = scalar_lea.hbm %s803_s0, 256  ;;  %p473_p5 = scmp.lt.s32.totalorder %s674_s28, %s803_s0 }
  0x1a   : > { %p470_p4 = pnand %p469_p3, %p468_p2  ;;  %p474_p8 = scmp.lt.s32.totalorder %s472_s8, %s467_s5 }
  0x1c   : > { %p471_p7 = pneg %p470_p4  ;;  %p475_p10 = por %p474_p8, %p473_p5 }
  0x1e   : > { %p476_p9 = pnand %p475_p10, %p471_p7 }
  0x20   : > { %479 = shalt.err (!%p476_p9)
}
  0x21   : > { %s480_s17 = scalar_lea.vmem %s682_s30, 128  ;;  %s591_s19 = smov [#allocation2]  }
  0x22   : > { %p481_p0 = scmp.ne.s32.totalorder %s682_s30, %s480_s17  ;;  %s485_s23 = sshll.u32 %s591_s19, 4  ;;  %s486_s23 = int_to_ptr.vmem [resolvable:$false] %s485_s23 }
  0x23   : > { %s487_s24 = scalar_lea.vmem %s486_s23, 256  ;;  %p488_p4 = scmp.lt.s32.totalorder %s682_s30, %s486_s23 }
  0x24   : > { %p483_p1 = pnand %p481_p0, %p469_p3  ;;  %p489_p12 = scmp.lt.s32.totalorder %s487_s24, %s480_s17 }
  0x26   : > { %p484_p2 = pneg %p483_p1  ;;  %p490_p11 = por %p489_p12, %p488_p4 }
  0x28   : > { %p491_p6 = pnand %p490_p11, %p484_p2 }
  0x2a   : > { %494 = shalt.err (!%p491_p6)
}
  0x2b   : > { %423 = dma.hbm_to_vmem [thread:$0]  (!%p678_p13), %s674_s28, 128, %s682_s30, %s119_s4  }
  0x2c   : > { %p813_p9 = scmp.lt.s32.totalorder %s589_s12, 3  ;;  %p814_p7 = scmp.ge.s32.totalorder %s589_s12, 1 }
  0x2e   : > { %p135_p0 = pnand %p814_p7, %p813_p9 }
  0x2f   : > { %s709_s25 = sand.u32 (!%p135_p0), 1, %s581_s10   ;;  %p815_p6 = scmp.ne.s32.totalorder (!%p135_p0), %s809_s20, 0 }
  0x30   : > { %138 = sbr.rel (%p135_p0) target bundleno = 289 (0x121), region = 24  ;;  %s712_s26 = sshll.u32 (!%p135_p0), %s709_s25, 3 }
  0x31   : > { %s141_s27 = scalar_lea.sflag (!%p135_p0), [#allocation3], %s709_s25  ;;  %s144_s29 = scalar_lea.vmem (!%p135_p0), [#allocation2], %s712_s26 }
  0x35   : > { %564 = dma.done.wait (%p815_p6), %s141_s27, 128  }
  0x36   : > { %566 = vsyncadd (%p815_p6), %s141_s27, 4294967168  ;;  %v171_v0 = vlaneseq  ;;  %v592_v1 = vmov 0.0   ;;  %vm593_vm0 = vmmov 0   ;;  %vm178_vm2 = vcmask 64512   ;;  %v170_v5 = vld [vmem:[%s144_s29] sm:$0xff]  ;;  %s403_s20 = sshll.u32 %s632_s13, 7 }
  0x37   : > { %409 = vmatprep.subr.mxu0 %v592_v1  ;;  %411 = vmatprep.mubr.msk.f32.mxu0 %vm593_vm0, %v592_v1  ;;  %s162_s28 = scalar_lea.vmem [#allocation5], %s712_s26  ;;  %vm252_vm3 = vcmask 261120   ;;  %s169_s3 = scalar_lea.vmem [#allocation6], %s712_s26 }
  0x38   : > { %v172_v2 = vshrl.u32 %v171_v0, 7  ;;  %v174_v3 = vand.u32 127, %v171_v0  ;;  %410 = vmatpush3.msra.mxu0 %v170_v5  ;;  %s275_s30 = sshll.u32 %s162_s28, 4  ;;  %s288_s4 = sshll.u32 %s169_s3, 4  ;;  %s730_s30 = int_to_ptr.vmem [resolvable:$true] %s275_s30  ;;  %s738_s4 = int_to_ptr.vmem [resolvable:$true] %s288_s4 }
  0x39   : > { %s728_s7 = scalar_lea.hbm %s804_s1, %s403_s20  ;;  %s736_s14 = scalar_lea.hbm %s805_s2, %s403_s20 }
  0x3a   : > { %vm175_vm1 = vcmp.le.s32.totalorder %v174_v3, %v172_v2  ;;  %s257_s16 = scalar_lea.sflag [#allocation4], %s709_s25  ;;  %s495_s17 = scalar_lea.vmem %s730_s30, 128 }
  0x3b   : > { %v399_v4 = vsel %vm175_vm1, 1.0, %v592_v1  ;;  %p496_p11 = scmp.ne.s32.totalorder %s730_s30, %s495_s17  ;;  %p816_p12 = scmp.ne.s32.totalorder %s810_s21, 0 }
  0x3c   : > { %412 = vmatmul.mubr.msk.f32.vlgmr.msra.gmra.mxu0 %vm178_vm2, %v399_v4  ;;  %s594_s19 = smov [#allocation5]  }
  0x3d   : > { %p497_p13 = pnand %p496_p11, %p816_p12  ;;  %s499_s23 = sshll.u32 %s594_s19, 4  ;;  %s500_s23 = int_to_ptr.vmem [resolvable:$false] %s499_s23 }
  0x3e   : > { %s501_s24 = scalar_lea.vmem %s500_s23, 256  ;;  %p502_p3 = scmp.lt.s32.totalorder %s730_s30, %s500_s23 }
  0x3f   : > { %p498_p1 = pneg %p497_p13  ;;  %p503_p5 = scmp.lt.s32.totalorder %s501_s24, %s495_s17 }
  0x41   : > { %p504_p8 = por %p503_p5, %p502_p3 }
  0x43   : > { %p505_p10 = pnand %p504_p8, %p498_p1 }
  0xfc   : > { %v248_v6 = vpop.f32.mrf.mxu0 }
  0xfd   : > { %253 = vst.msk [vmem:[%s162_s28] sm:$0xff] %vm252_vm3, %v248_v6  ;;  %v254_v7 = vsub.f32 %v248_v6, %v170_v5 }
  0xfe   : > { %v413_v8 = vpop.f32.mrf.mxu0 }
  0xff   : > { %508 = shalt.err (!%p505_p10)
}
 0x100   : > { %s509_s27 = scalar_lea.hbm %s728_s7, 128  ;;  %s513_s28 = scalar_lea.hbm %s804_s1, 256 }
 0x101   : > { %p510_p2 = scmp.ne.s32.totalorder %s728_s7, %s509_s27  ;;  %p514_p7 = scmp.lt.s32.totalorder %s728_s7, %s804_s1 }
 0x102   : > { %p515_p0 = scmp.lt.s32.totalorder %s513_s28, %s509_s27 }
 0x103   : > { %p511_p4 = pnand %p510_p2, %p816_p12 }
 0x104   : > { %p516_p6 = por %p515_p0, %p514_p7 }
 0x105   : > { %p512_p9 = pneg %p511_p4 }
 0x107   : > { %p517_p11 = pnand %p516_p6, %p512_p9 }
 0x109   : > { %520 = shalt.err (!%p517_p11)
}
 0x10a   : > { %416 = dma.vmem_to_hbm [thread:$0]  (%p816_p12), %s730_s30, 128, %s728_s7, %s257_s16   ;;  %255 = vst.msk [vmem:[%s169_s3] sm:$0xff] %vm252_vm3, %v254_v7 }
 0x10b   : > { %s262_s13 = scalar_lea.sflag [#allocation7], %s709_s25  ;;  %s521_s8 = scalar_lea.vmem %s738_s4, 128 }
 0x10c   : > { %p522_p13 = scmp.ne.s32.totalorder %s738_s4, %s521_s8  ;;  %s595_s17 = smov [#allocation6]  }
 0x10d   : > { %s525_s19 = sshll.u32 %s595_s17, 4  ;;  %s526_s19 = int_to_ptr.vmem [resolvable:$false] %s525_s19 }
 0x10e   : > { %p523_p1 = pnand %p522_p13, %p816_p12  ;;  %s527_s23 = scalar_lea.vmem %s526_s19, 256 }
 0x10f   : > { %p528_p5 = scmp.lt.s32.totalorder %s738_s4, %s526_s19  ;;  %p529_p8 = scmp.lt.s32.totalorder %s527_s23, %s521_s8 }
 0x110   : > { %p524_p3 = pneg %p523_p1 }
 0x111   : > { %p530_p10 = por %p529_p8, %p528_p5 }
 0x113   : > { %p531_p2 = pnand %p530_p10, %p524_p3 }
 0x115   : > { %534 = shalt.err (!%p531_p2)
}
 0x116   : > { %s535_s26 = scalar_lea.hbm %s736_s14, 128  ;;  %s539_s3 = scalar_lea.hbm %s805_s2, 256 }
 0x117   : > { %p536_p4 = scmp.ne.s32.totalorder %s736_s14, %s535_s26  ;;  %p540_p0 = scmp.lt.s32.totalorder %s736_s14, %s805_s2 }
 0x118   : > { %p541_p6 = scmp.lt.s32.totalorder %s539_s3, %s535_s26 }
 0x119   : > { %p537_p9 = pnand %p536_p4, %p816_p12 }
 0x11a   : > { %p542_p11 = por %p541_p6, %p540_p0 }
 0x11b   : > { %p538_p7 = pneg %p537_p9 }
 0x11d   : > { %p543_p13 = pnand %p542_p11, %p538_p7 }
 0x11f   : > { %546 = shalt.err (!%p543_p13)
}
 0x120   : > { %417 = dma.vmem_to_hbm [thread:$0]  (%p816_p12), %s738_s4, 128, %s736_s14, %s262_s13  }
 0x121 PF: > { %s300_s24 = sand.u32 1, %s577_s9   ;;  %p817_p1 = scmp.ne.s32.totalorder %s811_s22, 0 }
 0x122   : > { %p818_p3 = scmp.ge.s32.totalorder %s589_s12, 2  ;;  %s301_s27 = scalar_lea.sflag [#allocation4], %s300_s24 }
 0x124   : > { %p425_p5 = pnand %p818_p3, %p817_p1 }
 0x126   : > { %p426_p8 = pneg %p425_p5 }
 0x128   : > { %568 = dma.done.wait (%p426_p8), %s301_s27, 128  }
 0x129   : > { %570 = vsyncadd (%p426_p8), %s301_s27, 4294967168  ;;  %s310_s29 = scalar_lea.sflag [#allocation7], %s300_s24 }
 0x12a   : > { %572 = dma.done.wait (%p426_p8), %s310_s29, 128  }
 0x12b   : > { %574 = vsyncadd (%p426_p8), %s310_s29, 4294967168  ;;  %p19_p12 = scmp.ge.s32.totalorder %s636_s15, 4   ;;  %s819_s9 = smov %s581_s10 }
 0x12c   : > { %s820_s10 = smov %s585_s11  ;;  %s821_s11 = smov %s648_s18 }
 0x12d   : > { %s822_s12 = smov %s636_s15  ;;  %21 = sbr.rel (!%p19_p12) target bundleno = 7 (0x7), region = 86 }
 0x132   :  { %315 = vsyncpa [#allocation3], 1 }
 0x133   :  { %317 = vsyncpa [#allocation3 + $0x1], 1 }
 0x134   :  { %318 = vsyncpa [#allocation4], 1 }
 0x135   :  { %320 = vsyncpa [#allocation4 + $0x1], 1 }
 0x136   :  { %321 = vsyncpa [#allocation7], 1 }
 0x137   :  { %323 = vsyncpa [#allocation7 + $0x1], 1 }

</bundles_post_ra>
